<compile_context>
chip_gen: v5e
topology: v5e:2x2
jax: 0.10.0
libtpu: 0.0.40
codegen_flags: <defaults>
</compile_context>

<pallas_src>
import functools

import jax
import jax.numpy as jnp
from jax.experimental import pallas as pl
from jax.experimental.pallas import tpu as pltpu

LN_EPS = 1e-5  # PyTorch nn.LayerNorm default


def _round_up(n, m):
    return ((n + m - 1) // m) * m


# --------------------------------------------------------------------------- #
# Kernel
# --------------------------------------------------------------------------- #
def _make_kernel(num_k, tk):
    """Fused (x @ W + b + x) -> LayerNorm kernel, K-tiled over the contraction."""

    def kernel(x_ref, w_ref, p_ref, o_ref, acc_ref):
        # x_ref  : (TM, tk)  row tile of x, current K slice (native dtype)
        # w_ref  : (tk, D)   K slice of the func (Linear) weight, bf16
        # p_ref  : (3, D)    f32 stacked [func bias; ln gamma; ln beta]
        # o_ref  : (TM, D)
        # acc_ref: (TM, D)   f32 accumulator scratch (persists across K steps)
        k = pl.program_id(1)

        @pl.when(k == 0)
        def _():
            acc_ref[...] = jnp.zeros_like(acc_ref)

        x = x_ref[...]
        x_f32 = x.astype(jnp.float32)  # residual math in f32 (v5e: no bf16 VPU)

        # Partial matmul: bf16 operands on the MXU, f32 accumulation.
        acc_ref[...] += jnp.dot(x.astype(w_ref.dtype), w_ref[...],
                                preferred_element_type=jnp.float32)

        # Residual add: because W is square, the input columns of this K slice
        # are exactly output columns [k*tk, (k+1)*tk) -- add them once, here.
        if num_k == 1:
            acc_ref[...] += x_f32
        else:
            col0 = pl.multiple_of(k * tk, 128)  # tk is a multiple of 128 here
            acc_ref[:, pl.ds(col0, tk)] += x_f32

        @pl.when(k == num_k - 1)
        def _():
            fb = p_ref[0:1, :]
            gamma = p_ref[1:2, :]
            beta = p_ref[2:3, :]
            z = acc_ref[...] + fb
            # Two-pass moments: matches torch.nn.LayerNorm numerics (no
            # catastrophic cancellation for large activation means).
            mean = jnp.mean(z, axis=-1, keepdims=True)
            zc = z - mean
            var = jnp.mean(zc * zc, axis=-1, keepdims=True)
            z_hat = zc * jax.lax.rsqrt(var + LN_EPS)
            o_ref[...] = (z_hat * gamma + beta).astype(o_ref.dtype)

    return kernel


# --------------------------------------------------------------------------- #
# Tiling / VMEM planning
# --------------------------------------------------------------------------- #
@functools.lru_cache(maxsize=None)
def _vmem_budget_and_limit():
    """Generation-aware VMEM planning budget and vmem_limit_bytes."""
    cap = 0
    get_info = getattr(pltpu, "get_tpu_info", None)
    if get_info is not None:
        try:
            cap = int(get_info().vmem_capacity_bytes)
        except Exception:  # non-TPU backend / older runtime: use fallback below
            cap = 0
    if cap <= 0:
        cap = 64 * 1024 * 1024  # conservative fallback: v7x physical VMEM
    budget = int(cap * 0.75)    # what the tile planner may consume
    limit = int(cap * 0.85)     # headroom for compiler-internal scratch
    return budget, limit


def _plan_tiles(rows, D, x_itemsize, out_itemsize, w_itemsize, tile_rows, budget):
    sublane = 8 if x_itemsize >= 4 else 16
    rows_p = _round_up(max(rows, sublane), sublane)

    def vmem_need(tile, tk):
        return (2 * tk * D * w_itemsize          # W blocks (double buffered)
                + 2 * tile * tk * x_itemsize     # x blocks
                + 2 * tile * D * out_itemsize    # out blocks
                + tile * D * 4                   # f32 accumulator scratch
                + 3 * tile * D * 4               # epilogue f32 temporaries
                + 2 * 3 * D * 4)                 # fb/gamma/beta

    def pick_tk(tile):
        cands = [D]  # prefer no K-tiling (single K step)
        if D % 128 == 0:
            cands += [t for t in (1024, 512, 256, 128) if t < D and D % t == 0]
        for tk in cands:
            if vmem_need(tile, tk) <= budget:
                return tk, True
        return cands[-1], False

    def snap_to_divisor(t):
        # Largest divisor of rows_p (sublane multiple) <= t; fall back to t
        # itself (small tail pad) rather than accept a much smaller tile.
        cand = t
        while cand >= max(sublane, t // 2):
            if rows_p % cand == 0:
                return cand
            cand -= sublane
        return t

    # Row tile: big enough to amortize grid-step overhead / fill the MXU, but
    # keep >= 2 row steps so rows can shard across v7x's two TensorCores.
    tile = min(_round_up(int(tile_rows), sublane), rows_p)
    if rows_p // tile < 2 and rows_p >= 2 * sublane:
        tile = max(sublane, (rows_p // 2) // sublane * sublane)
    tile = snap_to_divisor(tile)

    tk, ok = pick_tk(tile)
    while not ok and tile > sublane:
        # Shrink rows in MXU-friendly 256 steps first, then halve.
        tile = tile - 256 if tile > 256 else max(sublane, (tile // 2) // sublane * sublane)
        tile = snap_to_divisor(tile)
        tk, ok = pick_tk(tile)

    rows_pad = _round_up(rows_p, tile)
    return tile, tk, rows_pad


# --------------------------------------------------------------------------- #
# Wrapper
# --------------------------------------------------------------------------- #
def _post_layernorm_impl(x, w, fb, gamma, beta, *, tile_rows=512,
                         matmul_dtype=jnp.bfloat16):
    """x: (B, S, D). Returns LayerNorm(x @ w + fb + x) over the last dim."""
    B, S, D = x.shape
    rows = B * S
    out_dtype = x.dtype
    x2 = x.reshape(rows, D)

    # In a real model do these once at parameter init; under jit they fuse.
    w_mm = w.astype(matmul_dtype)
    params = jnp.stack([fb, gamma, beta], axis=0).astype(jnp.float32)

    budget, vmem_limit = _vmem_budget_and_limit()
    tile, tk, rows_p = _plan_tiles(
        rows, D, x2.dtype.itemsize, jnp.dtype(out_dtype).itemsize,
        jnp.dtype(matmul_dtype).itemsize, tile_rows, budget)

    if rows_p != rows:
        # Tail pad only: tile is chosen to divide the row count when possible,
        # so this is usually absent (or a handful of rows), not a full copy.
        x2 = jnp.pad(x2, ((0, rows_p - rows), (0, 0)))

    grid_rows = rows_p // tile
    num_k = D // tk  # tk divides D by construction

    # TODO(synk): if D is not a multiple of 128 the output stores are masked
    # (vst.msk); pad/choose the model hidden size to a 128 multiple for speed.

    cost = pl.CostEstimate(
        flops=2 * rows_p * D * D + 10 * rows_p * D,
        transcendentals=rows_p,  # one rsqrt per row
        bytes_accessed=(rows_p * D * x2.dtype.itemsize
                        + rows_p * D * jnp.dtype(out_dtype).itemsize
                        + D * D * jnp.dtype(matmul_dtype).itemsize
                        * (grid_rows if num_k > 1 else 1)
                        + 3 * D * 4),
    )

    out = pl.pallas_call(
        _make_kernel(num_k, tk),
        out_shape=jax.ShapeDtypeStruct((rows_p, D), out_dtype),
        grid_spec=pltpu.PrefetchScalarGridSpec(
            num_scalar_prefetch=0,
            grid=(grid_rows, num_k),
            in_specs=[
                pl.BlockSpec((tile, tk), lambda i, k: (i, k)),  # x K-slice
                pl.BlockSpec((tk, D), lambda i, k: (k, 0)),     # W K-slice
                pl.BlockSpec((3, D), lambda i, k: (0, 0)),      # fb/gamma/beta
            ],
            out_specs=pl.BlockSpec((tile, D), lambda i, k: (i, 0)),
            scratch_shapes=[pltpu.VMEM((tile, D), jnp.float32)],
        ),
        compiler_params=pltpu.CompilerParams(
            dimension_semantics=("parallel", "arbitrary"),
            vmem_limit_bytes=vmem_limit,
        ),
        cost_estimate=cost,
    )(x2, w_mm, params)

    if rows_p != rows:
        out = out[:rows]
    return out.reshape(B, S, D)


post_layernorm = jax.jit(_post_layernorm_impl,
                         static_argnames=("tile_rows", "matmul_dtype"))


def post_layernorm_ref(x, w, fb, gamma, beta):
    # Faithful f32 reference of the PyTorch module (func = Linear).
    y = jnp.einsum("bsd,de->bse", x.astype(jnp.float32), w.astype(jnp.float32)) + fb
    z = y + x.astype(jnp.float32)
    mean = jnp.mean(z, axis=-1, keepdims=True)
    var = jnp.mean((z - mean) ** 2, axis=-1, keepdims=True)
    z_hat = (z - mean) * jax.lax.rsqrt(var + LN_EPS)
    return (z_hat * gamma + beta).astype(x.dtype)


if __name__ == "__main__":
    B, S, D = 2, 8, 32  # batch, seq, hidden (small demo shapes)

    key = jax.random.PRNGKey(0)
    kx, kw = jax.random.split(key)

    x = jax.random.normal(kx, (B, S, D), dtype=jnp.float32)

    # func = Linear(D, D); deterministic synthetic init (no checkpoint load).
    w = jax.random.normal(kw, (D, D), dtype=jnp.float32) * 0.05
    fb = jnp.zeros((D,), dtype=jnp.float32)

    # nn.LayerNorm default init: weight=1, bias=0.
    gamma = jnp.ones((D,), dtype=jnp.float32)
    beta = jnp.zeros((D,), dtype=jnp.float32)

    out = jax.block_until_ready(post_layernorm(x, w, fb, gamma, beta))
    ref = post_layernorm_ref(x, w, fb, gamma, beta)

    assert out.shape == (B, S, D)
    # bf16 MXU operands with f32 accumulation is an intentional precision
    # choice (matches mixed-precision training numerics); tolerance loosened
    # vs. the all-f32 reference accordingly.
    assert jnp.allclose(out, ref, atol=2e-2, rtol=2e-2), "mismatch vs reference"

    print("KERNEL_OK")
</pallas_src>

<mosaic_0001>
module attributes {stable_mosaic.version = 11 : i64} {
  func.func @kernel(%arg0: i32, %arg1: i32, %arg2: memref<8x32xf32, #tpu.memory_space<vmem>>, %arg3: memref<32x32xbf16, #tpu.memory_space<vmem>>, %arg4: memref<3x32xf32, #tpu.memory_space<vmem>>, %arg5: memref<8x32xf32, #tpu.memory_space<vmem>>, %arg6: memref<8x32xf32, #tpu.memory_space<vmem>>) attributes {dimension_semantics = [#tpu.dimension_semantics<parallel>, #tpu.dimension_semantics<arbitrary>], iteration_bounds = array<i64: 2, 1>, scalar_prefetch = 0 : i64, scratch_operands = 1 : i64, tpu.core_type = #tpu.core_type<tc>, window_params = [{transform_indices = @transform_0, window_bounds = array<i64: 8, 32>}, {transform_indices = @transform_1, window_bounds = array<i64: 32, 32>}, {pipeline_mode = #tpu.pipeline_mode<synchronous>, transform_indices = @transform_2, window_bounds = array<i64: 3, 32>}, {transform_indices = @transform_3, window_bounds = array<i64: 8, 32>}]} {
    %c0_i32 = arith.constant 0 : i32
    %0 = arith.cmpi eq, %arg1, %c0_i32 : i32
    %1 = arith.extui %0 : i1 to i32
    %c0_i32_0 = arith.constant 0 : i32
    %2 = arith.cmpi ne, %1, %c0_i32_0 : i32
    scf.if %2 {
      %cst_14 = arith.constant 0.000000e+00 : f32
      %16 = vector.broadcast %cst_14 : f32 to vector<8x32xf32>
      %c0_15 = arith.constant 0 : index
      %c0_16 = arith.constant 0 : index
      %17 = vector.load %arg6[%c0_15, %c0_16] : memref<8x32xf32, #tpu.memory_space<vmem>>, vector<8x32xf32>
      tpu.vector_store %arg6[%c0_15, %c0_16], %16 {strides = array<i32>} : memref<8x32xf32, #tpu.memory_space<vmem>>, vector<8x32xf32>,
    } else {
    }
    %c0 = arith.constant 0 : index
    %c0_1 = arith.constant 0 : index
    %3 = vector.load %arg2[%c0, %c0_1] : memref<8x32xf32, #tpu.memory_space<vmem>>, vector<8x32xf32>
    %c0_2 = arith.constant 0 : index
    %c0_3 = arith.constant 0 : index
    %4 = vector.load %arg6[%c0_2, %c0_3] : memref<8x32xf32, #tpu.memory_space<vmem>>, vector<8x32xf32>
    %5 = arith.truncf %3 : vector<8x32xf32> to vector<8x32xbf16>
    %c0_4 = arith.constant 0 : index
    %c0_5 = arith.constant 0 : index
    %6 = vector.load %arg3[%c0_4, %c0_5] : memref<32x32xbf16, #tpu.memory_space<vmem>>, vector<32x32xbf16>
    %cst = arith.constant dense<0.000000e+00> : vector<8x32xf32>
    %7 = tpu.matmul %5, %6, %cst {dimension_numbers = #tpu.dot_dimension_numbers<[1], [0], [0], [1], [0, 0, 1, 1], [], []>} : vector<8x32xbf16>, vector<32x32xbf16>, vector<8x32xf32> -> vector<8x32xf32>
    %8 = arith.addf %4, %7 : vector<8x32xf32>
    %c0_6 = arith.constant 0 : index
    %c0_7 = arith.constant 0 : index
    %9 = vector.load %arg6[%c0_6, %c0_7] : memref<8x32xf32, #tpu.memory_space<vmem>>, vector<8x32xf32>
    tpu.vector_store %arg6[%c0_6, %c0_7], %8 {strides = array<i32>} : memref<8x32xf32, #tpu.memory_space<vmem>>, vector<8x32xf32>,
    %c0_8 = arith.constant 0 : index
    %c0_9 = arith.constant 0 : index
    %10 = vector.load %arg6[%c0_8, %c0_9] : memref<8x32xf32, #tpu.memory_space<vmem>>, vector<8x32xf32>
    %11 = arith.addf %10, %3 : vector<8x32xf32>
    %c0_10 = arith.constant 0 : index
    %c0_11 = arith.constant 0 : index
    %12 = vector.load %arg6[%c0_10, %c0_11] : memref<8x32xf32, #tpu.memory_space<vmem>>, vector<8x32xf32>
    tpu.vector_store %arg6[%c0_10, %c0_11], %11 {strides = array<i32>} : memref<8x32xf32, #tpu.memory_space<vmem>>, vector<8x32xf32>,
    %c0_i32_12 = arith.constant 0 : i32
    %13 = arith.cmpi eq, %arg1, %c0_i32_12 : i32
    %14 = arith.extui %13 : i1 to i32
    %c0_i32_13 = arith.constant 0 : i32
    %15 = arith.cmpi ne, %14, %c0_i32_13 : i32
    scf.if %15 {
      %c0_14 = arith.constant 0 : index
      %c0_15 = arith.constant 0 : index
      %16 = vector.load %arg4[%c0_14, %c0_15] : memref<3x32xf32, #tpu.memory_space<vmem>>, vector<1x32xf32>
      %c1 = arith.constant 1 : index
      %c0_16 = arith.constant 0 : index
      %17 = vector.load %arg4[%c1, %c0_16] : memref<3x32xf32, #tpu.memory_space<vmem>>, vector<1x32xf32>
      %c2 = arith.constant 2 : index
      %c0_17 = arith.constant 0 : index
      %18 = vector.load %arg4[%c2, %c0_17] : memref<3x32xf32, #tpu.memory_space<vmem>>, vector<1x32xf32>
      %c0_18 = arith.constant 0 : index
      %c0_19 = arith.constant 0 : index
      %19 = vector.load %arg6[%c0_18, %c0_19] : memref<8x32xf32, #tpu.memory_space<vmem>>, vector<8x32xf32>
      %20 = vector.broadcast %16 : vector<1x32xf32> to vector<8x32xf32>
      %21 = arith.addf %19, %20 : vector<8x32xf32>
      %cst_20 = arith.constant dense<0.000000e+00> : vector<8xf32>
      %22 = vector.multi_reduction <add>, %21, %cst_20 [1] : vector<8x32xf32> to vector<8xf32>
      %23 = vector.shape_cast %22 : vector<8xf32> to vector<8x1xf32>
      %cst_21 = arith.constant 3.200000e+01 : f32
      %24 = vector.broadcast %cst_21 : f32 to vector<8x1xf32>
      %25 = arith.divf %23, %24 : vector<8x1xf32>
      %26 = vector.broadcast %25 : vector<8x1xf32> to vector<8x32xf32>
      %27 = arith.subf %21, %26 : vector<8x32xf32>
      %28 = arith.mulf %27, %27 : vector<8x32xf32>
      %cst_22 = arith.constant dense<0.000000e+00> : vector<8xf32>
      %29 = vector.multi_reduction <add>, %28, %cst_22 [1] : vector<8x32xf32> to vector<8xf32>
      %30 = vector.shape_cast %29 : vector<8xf32> to vector<8x1xf32>
      %cst_23 = arith.constant 3.200000e+01 : f32
      %31 = vector.broadcast %cst_23 : f32 to vector<8x1xf32>
      %32 = arith.divf %30, %31 : vector<8x1xf32>
      %cst_24 = arith.constant 9.99999974E-6 : f32
      %33 = vector.broadcast %cst_24 : f32 to vector<8x1xf32>
      %34 = arith.addf %32, %33 : vector<8x1xf32>
      %35 = math.rsqrt %34 : vector<8x1xf32>
      %36 = vector.broadcast %35 : vector<8x1xf32> to vector<8x32xf32>
      %37 = arith.mulf %27, %36 : vector<8x32xf32>
      %38 = vector.broadcast %17 : vector<1x32xf32> to vector<8x32xf32>
      %39 = arith.mulf %37, %38 : vector<8x32xf32>
      %40 = vector.broadcast %18 : vector<1x32xf32> to vector<8x32xf32>
      %41 = arith.addf %39, %40 : vector<8x32xf32>
      %c0_25 = arith.constant 0 : index
      %c0_26 = arith.constant 0 : index
      %42 = vector.load %arg5[%c0_25, %c0_26] : memref<8x32xf32, #tpu.memory_space<vmem>>, vector<8x32xf32>
      tpu.vector_store %arg5[%c0_25, %c0_26], %41 {strides = array<i32>} : memref<8x32xf32, #tpu.memory_space<vmem>>, vector<8x32xf32>,
    } else {
    }
    return
  }
  func.func @transform_0(%arg0: i32, %arg1: i32) -> (i32, i32) {
    %c0_i32 = arith.constant 0 : i32
    return %arg0, %arg1 : i32, i32
  }
  func.func @transform_1(%arg0: i32, %arg1: i32) -> (i32, i32) {
    %c0_i32 = arith.constant 0 : i32
    %c0_i32_0 = arith.constant 0 : i32
    return %arg1, %c0_i32 : i32, i32
  }
  func.func @transform_2(%arg0: i32, %arg1: i32) -> (i32, i32) {
    %c0_i32 = arith.constant 0 : i32
    %c0_i32_0 = arith.constant 0 : i32
    %c0_i32_1 = arith.constant 0 : i32
    return %c0_i32, %c0_i32_0 : i32, i32
  }
  func.func @transform_3(%arg0: i32, %arg1: i32) -> (i32, i32) {
    %c0_i32 = arith.constant 0 : i32
    %c0_i32_0 = arith.constant 0 : i32
    return %arg0, %c0_i32 : i32, i32
  }
}

</mosaic_0001>

<bundles_post_ra>
// kernel: _post_layernorm_impl.1
= control target key start
LH: loop header
LB: loop body
LE: loop exit
PB: predicated region body
PF: predicated region fallthrough
CT: control target
= control target key end

     0   :  { %8 = vsyncpa [#allocation4], 0  ;;  %s711_s0 = inlined_call_operand.vmem [shape: f32[16,32], index: 0, kind: input, shape index: {}]   ;;  %s712_s1 = inlined_call_operand.vmem [shape: bf16[32,32], index: 1, kind: input, shape index: {}]   ;;  %s713_s2 = inlined_call_operand.vmem [shape: f32[3,32], index: 2, kind: input, shape index: {}]   ;;  %s714_s3 = inlined_call_operand.hbm [shape: f32[16,32], index: 3, kind: output, shape index: {}]  }
   0x1   :  { %10 = vsyncpa [#allocation4 + $0x1], 0  ;;  %s592_s12 = smov 0   ;;  %s594_s13 = smov 0  }
   0x2   :  { %s596_s14 = smov 0   ;;  %s598_s15 = smov 0  }
   0x3   :  { %s600_s16 = smov 0   ;;  %s602_s17 = smov 0  }
   0x4 LB: > { %s403_s18 = sadd.s32 4294967295, %s568_s17   ;;  %s404_s19 = sadd.s32 4294967294, %s568_s17   ;;  %s568_s17 = sphi %s602_s17, %s16_s17   ;;  %s564_s16 = sphi %s600_s16, %s721_s16   ;;  %s560_s15 = sphi %s598_s15, %s720_s15   ;;  %s556_s14 = sphi %s596_s14, %s719_s14   ;;  %s552_s13 = sphi %s594_s13, %s718_s13   ;;  %s548_s12 = sphi %s592_s12, %s717_s12  }
   0x5   : > { %s28_s20 = sadd.s32 1, %s564_s16  ;;  %s110_s21 = sadd.s32 1, %s556_s14 }
   0x6   : > { %p30_p0 = scmp.ge.s32.totalorder %s28_s20, 2  ;;  %p120_p1 = scmp.ne.s32.totalorder %s556_s14, %s552_s13 }
   0x7   : > { %p121_p2 = scmp.eq.s32.totalorder %s403_s18, 1  ;;  %p126_p3 = scmp.ne.s32.totalorder %s552_s13, %s548_s12 }
   0x8   : > { %s723_s20 = smov (%p30_p0, %s28_s20), 0  ;;  %p127_p5 = scmp.eq.s32.totalorder %s404_s19, 1 }
   0x9   : > { %p632_p4 = por %p121_p2, %p120_p1  ;;  %s107_s23 = ssub.s32 %s564_s16, %s723_s20 }
   0xa   : > { %p408_p6 = scmp.ge.s32.totalorder %s568_s17, 1  ;;  %p108_p7 = scmp.eq.s32.totalorder %s107_s23, 0 }
   0xb   : > { %p639_p8 = por %p127_p5, %p126_p3  ;;  %p167_p9 = scmp.lt.s32.totalorder %s568_s17, 3 }
   0xc   : > { %s645_s25 = scalar_select %p108_p7, %s556_s14, %s110_s21  }
   0xd   : > { %p168_p10 = pnand %p408_p6, %p167_p9 }
   0xe   : > { %p198_p11 = scmp.lt.s32.totalorder (!%p168_p10), %s560_s15, 1  ;;  %s195_s10 = sand.u32 (!%p168_p10), 1, %s552_s13  }
   0xf   : > { %171 = sbr.rel (%p168_p10) target bundleno = 447 (0x1bf), region = 32  ;;  %s409_s11 = sshll.u32 (!%p168_p10), %s195_s10, 3 }
  0x10   : > { %s421_s18 = sshll.u32 (!%p168_p10), %s560_s15, 3  ;;  %s303_s5 = scalar_lea.sflag (!%p168_p10), [#allocation4], %s195_s10 }
  0x11   : > { %s313_s27 = scalar_lea.hbm (!%p168_p10), %s714_s3, %s421_s18 }
  0x14   : > { %v425_v0 = vld [vmem:[%s712_s1 + $0x8] sm:$0xff]  ;;  %vm216_vm0 = vcmask 261120   ;;  %v570_v1 = vmov 0.0   ;;  %v424_v2 = vld [vmem:[%s712_s1] sm:$0xff]  ;;  %s199_s30 = scalar_select %p198_p11, %s560_s15, 1  ;;  %v571_v15 = vmov 32.0  }
  0x15   : > { %217 = vst.msk [vmem:[#allocation2] sm:$0xff] %vm216_vm0, %v570_v1  ;;  %247 = vmatpush.bf16.msra.mxu0 %v425_v0  ;;  %v483_v11 = vld [vmem:[%s713_s2] ss:$0 sm:$0xff]  ;;  %486 = vrcp.f32 %v571_v15  ;;  %v484_v36 = vld [vmem:[%s713_s2 + $0x1] ss:$0 sm:$0xff] }
  0x16   : > { %s410_s4 = sshll.u32 %s199_s30, 3  ;;  %v485_v39 = vld [vmem:[%s713_s2 + $0x2] ss:$0 sm:$0xff]  ;;  %s197_s30 = scalar_lea.vmem [#allocation3], %s409_s11 }
  0x17   : > { %s204_s7 = scalar_lea.vmem %s711_s0, %s410_s4  ;;  %s315_s15 = sshll.u32 %s197_s30, 4  ;;  %s316_s15 = int_to_ptr.vmem [resolvable:$true] %s315_s15 }
  0x18   : > { %v218_v3 = vld [vmem:[%s204_s7] sm:$0xff]  ;;  %s317_s4 = sshll.u32 %s313_s27, 4  ;;  %s510_s11 = scalar_lea.hbm %s714_s3, 16  ;;  %s318_s4 = int_to_ptr.hbm [resolvable:$true] %s317_s4 }
  0x19   : > { %248 = vmatpush.bf16.msra.mxu0 %v424_v2  ;;  %v220_v4 = vpack.c.bf16 %v218_v3, %v218_v3  ;;  %s504_s6 = sshra.s32 %s318_s4, 4  ;;  %s505_s6 = int_to_ptr.hbm [resolvable:$true] %s504_s6 }
  0x1a   : > { %s506_s7 = scalar_lea.hbm %s505_s6, 8  ;;  %p511_p1 = scmp.lt.s32.totalorder %s505_s6, %s714_s3 }
  0x1b   : > { %v487_v16 = vpop.eup %486  ;;  %p507_p12 = scmp.ne.s32.totalorder %s505_s6, %s506_s7  ;;  %p512_p2 = scmp.lt.s32.totalorder %s510_s11, %s506_s7 }
  0x1c   : > { %419 = vmatmul.msk.bf16.vlgmr.msra.gmra.mxu0 %vm216_vm0, %v220_v4  ;;  %v219_v5 = vld [vmem:[#allocation2] sm:$0xff]  ;;  %v272_v17 = vmul.f32 32.0, %v487_v16  ;;  %vm276_vm1 = vweird.f32 %v487_v16 }
  0x1d   : > { %p508_p13 = pnand %p507_p12, %p632_p4  ;;  %p513_p3 = por %p512_p2, %p511_p1 }
  0x1e   : > { %v273_v18 = vsub.f32 1.0, %v272_v17 }
  0x1f   : > { %p509_p0 = pneg %p508_p13 }
  0x20   : > { %v274_v19 = vmul.f32 %v487_v16, %v273_v18 }
  0x21   : > { %p514_p5 = pnand %p513_p3, %p509_p0 }
  0x22   : > { %v275_v20 = vadd.f32 %v487_v16, %v274_v19 }
  0x24   : > { %v277_v21 = vsel %vm276_vm1, %v487_v16, %v275_v20 }
  0x99   : > { %v250_v6 = vpop.f32.mrf.mxu0 }
  0x9a   : > { %v254_v7 = vadd.f32 %v250_v6, %v219_v5 }
  0x9c   : > { %255 = vst.msk [vmem:[#allocation2] sm:$0xff] %vm216_vm0, %v254_v7 }
  0xa1   : > { %v252_v8 = vpop.f32.mrf.mxu0 }
  0xa3   : > { %v256_v9 = vld [vmem:[#allocation2] sm:$0xff] }
  0xa4   : > { %v257_v10 = vadd.f32 %v256_v9, %v218_v3 }
  0xa6   : > { %258 = vst.msk [vmem:[#allocation2] sm:$0xff] %vm216_vm0, %v257_v10 }
  0xad   : > { %v265_v12 = vld [vmem:[#allocation2] sm:$0xff] }
  0xae   : > { %v267_v13 = vadd.f32 %v483_v11, %v265_v12 }
  0xb0   : > { %v268_v14 = vsel %vm216_vm0, %v267_v13, 0.0 }
  0xb1   : > { %269 = vadd.xlane.f32.xlu0 %v268_v14 }
 0x124   : > { %v270_v22 = vpop.xlane.xlu0 %269 }
 0x125   : > { %v278_v23 = vmul.f32 %v277_v21, %v270_v22 }
 0x127   : > { %v279_v24 = vsub.f32 %v267_v13, %v278_v23 }
 0x129   : > { %v280_v25 = vmul.f32 %v279_v24, %v279_v24 }
 0x12b   : > { %v281_v26 = vsel %vm216_vm0, %v280_v25, 0.0 }
 0x12c   : > { %282 = vadd.xlane.f32.xlu0 %v281_v26 }
 0x19f   : > { %v283_v27 = vpop.xlane.xlu0 %282 }
 0x1a0   : > { %v284_v28 = vmul.f32 %v283_v27, %v277_v21 }
 0x1a2   : > { %v285_v29 = vadd.f32 1e-05, %v284_v28 }
 0x1a4   : > { %488 = vrsqrt.f32 %v285_v29  ;;  %vm292_vm3 = vweird.f32 %v285_v29 }
 0x1aa   : > { %v489_v30 = vpop.eup %488 }
 0x1ab   : > { %v287_v31 = vmul.f32 %v489_v30, %v285_v29  ;;  %vm293_vm2 = vweird.f32 %v489_v30 }
 0x1ac   : > { %vm294_vm4 = vmor %vm292_vm3, %vm293_vm2 }
 0x1ad   : > { %v288_v32 = vmul.f32 %v489_v30, %v287_v31 }
 0x1af   : > { %v289_v33 = vmul.f32 0.5, %v288_v32 }
 0x1b1   : > { %v290_v34 = vsub.f32 1.5, %v289_v33 }
 0x1b3   : > { %v291_v35 = vmul.f32 %v489_v30, %v290_v34 }
 0x1b5   : > { %v295_v37 = vsel %vm294_vm4, %v489_v30, %v291_v35 }
 0x1b6   : > { %v296_v38 = vmul.f32 %v295_v37, %v279_v24 }
 0x1b8   : > { %v298_v40 = vmul.f32 %v484_v36, %v296_v38 }
 0x1ba   : > { %v300_v41 = vadd.f32 %v485_v39, %v298_v40 }
 0x1bc   : > { %301 = vst.msk [vmem:[%s197_s30] sm:$0xff] %vm216_vm0, %v300_v41 }
 0x1bd   : > { %517 = shalt.err (!%p514_p5)
}
 0x1be   : > { %426 = dma.vmem_to_hbm [thread:$0]  (%p632_p4), %s316_s15, 128, %s318_s4, %s303_s5  }
 0x1bf PF: > { %p432_p6 = scmp.ge.s32.totalorder %s568_s17, 2  ;;  %s329_s10 = sand.u32 1, %s548_s12  }
 0x1c0   : > { %s330_s21 = scalar_lea.sflag [#allocation4], %s329_s10 }
 0x1c1   : > { %p429_p7 = pnand %p432_p6, %p639_p8 }
 0x1c3   : > { %p430_p9 = pneg %p429_p7 }
 0x1c5   : > { %543 = dma.done.wait (%p430_p9), %s330_s21, 128  }
 0x1c6   : > { %545 = vsyncadd (%p430_p9), %s330_s21, 4294967168  ;;  %s16_s17 = sadd.s32 1, %s568_s17   ;;  %s717_s12 = smov %s552_s13 }
 0x1c7   : > { %p13_p10 = scmp.ge.s32.totalorder %s16_s17, 4   ;;  %s718_s13 = smov %s556_s14 }
 0x1c8   : > { %s719_s14 = smov %s645_s25  ;;  %s720_s15 = smov %s564_s16 }
 0x1c9   : > { %s721_s16 = smov %s723_s20  ;;  %15 = sbr.rel (!%p13_p10) target bundleno = 4 (0x4), region = 78 }
 0x1ce   :  { %336 = vsyncpa [#allocation4], 1 }
 0x1cf   :  { %338 = vsyncpa [#allocation4 + $0x1], 1 }

</bundles_post_ra>
